<compile_context>
chip_gen: v7x
topology: tpu7x:2x2x1
jax: 0.10.0
libtpu: 0.0.40
codegen_flags: <defaults>
</compile_context>

<pallas_src>
import math
import functools

import jax
import jax.numpy as jnp
from jax.experimental import pallas as pl
from jax.experimental.pallas import tpu as pltpu


def _round_up(a, m):
    return (a + m - 1) // m * m


# ---------------------------------------------------------------------------
# Kernel 1: fused QKV projection — computed once per (batch, row tile).
# ---------------------------------------------------------------------------
def _qkv_proj_kernel(x_ref, wq_ref, wk_ref, wv_ref, bq_ref, bk_ref, bv_ref,
                     q_ref, k_ref, v_ref):
    x = x_ref[...]                                           # (tr, D) bf16
    for w_ref, b_ref, out_ref in ((wq_ref, bq_ref, q_ref),
                                  (wk_ref, bk_ref, k_ref),
                                  (wv_ref, bv_ref, v_ref)):
        out_ref[...] = (jnp.dot(x, w_ref[...],
                                preferred_element_type=jnp.float32)
                        + b_ref[...]).astype(out_ref.dtype)


# ---------------------------------------------------------------------------
# Kernel 2: flash attention (online softmax over KV tiles) + out projection.
# ---------------------------------------------------------------------------
def _flash_attn_kernel(q_ref, k_ref, v_ref, wo_ref, bo_ref, o_ref,
                       qh_sc, m_sc, l_sc, acc_sc, *,
                       n_heads, d_head, tq, tk, seq_len, seq_len_pad, causal):
    H, dh = n_heads, d_head
    D = H * dh
    qi = pl.program_id(1)
    ki = pl.program_id(2)
    q_start = qi * tq
    kv_start = ki * tk

    @pl.when(ki == 0)
    def _init():
        # Split heads once per q tile and stash in scratch so later KV steps
        # don't redo the relayout.
        qh_sc[...] = jnp.swapaxes(q_ref[...].reshape(tq, H, dh), 0, 1)
        m_sc[...] = jnp.full_like(m_sc, -1e30)
        l_sc[...] = jnp.zeros_like(l_sc)
        acc_sc[...] = jnp.zeros_like(acc_sc)

    def _compute():
        kh = jnp.swapaxes(k_ref[...].reshape(tk, H, dh), 0, 1)   # (H, tk, dh)
        vh = jnp.swapaxes(v_ref[...].reshape(tk, H, dh), 0, 1)   # (H, tk, dh)
        s = jnp.einsum("hqd,hkd->hqk", qh_sc[...], kh,
                       preferred_element_type=jnp.float32)       # (H, tq, tk)

        pad = seq_len_pad > seq_len                              # static
        if causal or pad:
            rows = jax.lax.broadcasted_iota(jnp.int32, (tq, tk), 0) + q_start
            cols = jax.lax.broadcasted_iota(jnp.int32, (tq, tk), 1) + kv_start
            if causal and pad:
                bad = jnp.logical_or(cols > rows, cols >= seq_len)
            elif causal:
                bad = cols > rows
            else:
                bad = cols >= seq_len
            s = jnp.where(bad[None, :, :], jnp.float32(-1e30), s)

        m_prev = m_sc[...]
        m_new = jnp.maximum(m_prev, jnp.max(s, axis=-1, keepdims=True))
        alpha = jnp.exp(m_prev - m_new)
        # TODO(synk): on v6e/v7x the exp could run in bf16 (packed EUP path);
        # kept in f32 so the same kernel is also correct/fast on v5e.
        p = jnp.exp(s - m_new)
        l_sc[...] = alpha * l_sc[...] + jnp.sum(p, axis=-1, keepdims=True)
        acc_sc[...] = alpha * acc_sc[...] + jnp.einsum(
            "hqk,hkd->hqd", p.astype(jnp.bfloat16), vh,
            preferred_element_type=jnp.float32)
        m_sc[...] = m_new

    if causal:
        # KV tiles entirely above the diagonal contribute nothing: skip the
        # matmuls / exp (their DMA is also suppressed by the clamped
        # index_map in the wrapper).
        @pl.when(kv_start <= q_start + tq - 1)
        def _():
            _compute()
    else:
        _compute()

    @pl.when(ki == pl.num_programs(2) - 1)
    def _finalize():
        ctx = acc_sc[...] * pl.reciprocal(l_sc[...], approx=True)  # (H,tq,dh)
        ctx = jnp.swapaxes(ctx.astype(jnp.bfloat16), 0, 1).reshape(tq, D)
        y = (jnp.dot(ctx, wo_ref[...], preferred_element_type=jnp.float32)
             + bo_ref[...])
        o_ref[...] = y.astype(o_ref.dtype)


def self_attention_pallas(x, w_in, b_in, w_out, b_out, *, n_heads,
                          causal_mask=False, q_tile=256,
                          compute_dtype=jnp.bfloat16,
                          vmem_limit_bytes=48 * 1024 * 1024):
    """x: (B, S, D); w_in: (3D, D) torch-style; b_in: (3D,);
    w_out: (D, D) torch-style; b_out: (D,).

    q_tile: pick multiples of 256 on v6e/v7x, 128 on v5e."""
    B, S, D = x.shape
    assert D % n_heads == 0
    d_head = D // n_heads
    scale = 1.0 / math.sqrt(d_head)

    # One tile size for q rows and kv columns; pad S up to a tile multiple
    # (never silently fall back to tq = S for non-divisible sequences).
    tile = _round_up(min(q_tile, S), 8)
    s_pad = _round_up(S, tile)
    n_tiles = s_pad // tile
    tq = tk = tile

    f32 = jnp.float32
    w_in = w_in.astype(f32)
    b_in = b_in.astype(f32)

    # torch nn.Linear: y = x @ W^T + b, W is (out_features, in_features).
    # Split the fused in-projection, pre-transpose to (in, out), fold the
    # 1/sqrt(d_head) scale into the Q block, cast weights to bf16 once.
    wq_t = (w_in[0 * D:1 * D, :].T * scale).astype(compute_dtype)   # (D, D)
    wk_t = w_in[1 * D:2 * D, :].T.astype(compute_dtype)             # (D, D)
    wv_t = w_in[2 * D:3 * D, :].T.astype(compute_dtype)             # (D, D)
    wo_t = w_out.astype(f32).T.astype(compute_dtype)                # (D, D)

    bq = (b_in[0 * D:1 * D] * scale).reshape(1, D)                  # f32
    bk = b_in[1 * D:2 * D].reshape(1, D)
    bv = b_in[2 * D:3 * D].reshape(1, D)
    bo = b_out.astype(f32).reshape(1, D)

    x_c = x.astype(compute_dtype)
    if s_pad > S:
        x_c = jnp.pad(x_c, ((0, 0), (0, s_pad - S), (0, 0)))

    # ---- pass 1: Q/K/V projections, exactly once per row tile ----
    qkv_shape = jax.ShapeDtypeStruct((B, s_pad, D), compute_dtype)
    q, k, v = pl.pallas_call(
        _qkv_proj_kernel,
        out_shape=(qkv_shape, qkv_shape, qkv_shape),
        grid_spec=pltpu.PrefetchScalarGridSpec(
            num_scalar_prefetch=0,
            grid=(B, n_tiles),
            in_specs=[
                pl.BlockSpec((None, tile, D), lambda b, r: (b, r, 0)),  # x
                pl.BlockSpec((D, D), lambda b, r: (0, 0)),   # W_q^T (scaled)
                pl.BlockSpec((D, D), lambda b, r: (0, 0)),   # W_k^T
                pl.BlockSpec((D, D), lambda b, r: (0, 0)),   # W_v^T
                pl.BlockSpec((1, D), lambda b, r: (0, 0)),   # b_q (scaled)
                pl.BlockSpec((1, D), lambda b, r: (0, 0)),   # b_k
                pl.BlockSpec((1, D), lambda b, r: (0, 0)),   # b_v
            ],
            out_specs=[
                pl.BlockSpec((None, tile, D), lambda b, r: (b, r, 0)),
                pl.BlockSpec((None, tile, D), lambda b, r: (b, r, 0)),
                pl.BlockSpec((None, tile, D), lambda b, r: (b, r, 0)),
            ],
        ),
        compiler_params=pltpu.CompilerParams(
            dimension_semantics=("parallel", "parallel"),
            vmem_limit_bytes=vmem_limit_bytes),
    )(x_c, wq_t, wk_t, wv_t, bq, bk, bv)

    # ---- pass 2: flash attention over KV tiles + out projection ----
    if causal_mask:
        # Clamp the KV block index at the diagonal: tiles above it are
        # skipped in-kernel, so don't DMA fresh data for them (tq == tk).
        kv_map = lambda b, qi, ki: (b, jnp.minimum(ki, qi), 0)
    else:
        kv_map = lambda b, qi, ki: (b, ki, 0)

    kernel = functools.partial(
        _flash_attn_kernel, n_heads=n_heads, d_head=d_head, tq=tq, tk=tk,
        seq_len=S, seq_len_pad=s_pad, causal=causal_mask)

    out = pl.pallas_call(
        kernel,
        out_shape=jax.ShapeDtypeStruct((B, s_pad, D), x.dtype),
        grid_spec=pltpu.PrefetchScalarGridSpec(
            num_scalar_prefetch=0,
            grid=(B, n_tiles, n_tiles),
            in_specs=[
                pl.BlockSpec((None, tq, D), lambda b, qi, ki: (b, qi, 0)),  # Q
                pl.BlockSpec((None, tk, D), kv_map),                        # K
                pl.BlockSpec((None, tk, D), kv_map),                        # V
                # Invariant weight/bias (constant index map => no re-DMA).
                # TODO(synk): pipeline_mode=pl.Buffered(1) would also drop
                # their second VMEM buffer if more headroom is needed on v7x.
                pl.BlockSpec((D, D), lambda b, qi, ki: (0, 0)),             # W_o^T
                pl.BlockSpec((1, D), lambda b, qi, ki: (0, 0)),             # b_o
            ],
            out_specs=pl.BlockSpec((None, tq, D), lambda b, qi, ki: (b, qi, 0)),
            scratch_shapes=[
                pltpu.VMEM((n_heads, tq, d_head), compute_dtype),   # qh
                pltpu.VMEM((n_heads, tq, 1), jnp.float32),          # m
                pltpu.VMEM((n_heads, tq, 1), jnp.float32),          # l
                pltpu.VMEM((n_heads, tq, d_head), jnp.float32),     # acc
            ],
        ),
        compiler_params=pltpu.CompilerParams(
            dimension_semantics=("parallel", "parallel", "arbitrary"),
            vmem_limit_bytes=vmem_limit_bytes),
    )(q, k, v, wo_t, bo)

    return out[:, :S, :] if s_pad > S else out


def self_attention_ref(x, w_in, b_in, w_out, b_out, *, n_heads,
                       causal_mask=False):
    """Pure-JAX f32 reference matching the PyTorch forward."""
    B, S, D = x.shape
    d_head = D // n_heads
    qkv = x @ w_in.T + b_in
    q, k, v = jnp.split(qkv, 3, axis=-1)
    q = q.reshape(B, S, n_heads, d_head).transpose(0, 2, 1, 3)
    k = k.reshape(B, S, n_heads, d_head).transpose(0, 2, 1, 3)
    v = v.reshape(B, S, n_heads, d_head).transpose(0, 2, 1, 3)
    w = jnp.einsum("bhqd,bhkd->bhqk", q, k)
    if causal_mask:
        mask = jnp.triu(jnp.ones((S, S), dtype=bool), 1)
        w = jnp.where(mask, -jnp.inf, w)
    w = w / math.sqrt(d_head)
    w = jax.nn.softmax(w, axis=-1)
    out = jnp.einsum("bhqk,bhkd->bhqd", w, v)
    out = out.transpose(0, 2, 1, 3).reshape(B, S, D)
    return out @ w_out.T + b_out


if __name__ == "__main__":
    # bf16 matmul inputs + approx reciprocal -> loosened tolerance vs f32 ref.
    ATOL = RTOL = 3e-2

    def make_inputs(key, B, S, D):
        kx, kw1, kb1, kw2, kb2 = jax.random.split(key, 5)
        x = jax.random.normal(kx, (B, S, D), dtype=jnp.float32)
        # torch Linear shapes: (out_features, in_features)
        w_in = jax.random.normal(kw1, (3 * D, D), dtype=jnp.float32) * 0.05
        b_in = jax.random.normal(kb1, (3 * D,), dtype=jnp.float32) * 0.05
        w_out = jax.random.normal(kw2, (D, D), dtype=jnp.float32) * 0.05
        b_out = jax.random.normal(kb2, (D,), dtype=jnp.float32) * 0.05
        return x, w_in, b_in, w_out, b_out

    key = jax.random.PRNGKey(0)
    k1, k2 = jax.random.split(key)

    # Case A: small single-tile shapes (B=2, S=8, D=32, H=4), both mask modes.
    args = make_inputs(k1, 2, 8, 32)
    for causal in (False, True):
        out = jax.block_until_ready(
            self_attention_pallas(*args, n_heads=4, causal_mask=causal))
        ref = self_attention_ref(*args, n_heads=4, causal_mask=causal)
        err = float(jnp.max(jnp.abs(out - ref)))
        assert jnp.allclose(out, ref, atol=ATOL, rtol=RTOL), (
            f"case A causal={causal}: max err {err}")

    # Case B: multi-KV-tile flash path with padding (S=40 with 16-row tiles):
    # exercises online softmax, key-pad masking and causal tile skipping.
    args = make_inputs(k2, 1, 40, 32)
    for causal in (False, True):
        out = jax.block_until_ready(
            self_attention_pallas(*args, n_heads=4, causal_mask=causal,
                                  q_tile=16))
        ref = self_attention_ref(*args, n_heads=4, causal_mask=causal)
        err = float(jnp.max(jnp.abs(out - ref)))
        assert jnp.allclose(out, ref, atol=ATOL, rtol=RTOL), (
            f"case B causal={causal}: max err {err}")

    print("KERNEL_OK")
</pallas_src>

<mosaic_0001>
module attributes {stable_mosaic.version = 11 : i64} {
  func.func @_qkv_proj_kernel(%arg0: i32, %arg1: i32, %arg2: memref<1x8x32xbf16, #tpu.memory_space<vmem>>, %arg3: memref<32x32xbf16, #tpu.memory_space<vmem>>, %arg4: memref<32x32xbf16, #tpu.memory_space<vmem>>, %arg5: memref<32x32xbf16, #tpu.memory_space<vmem>>, %arg6: memref<1x32xf32, #tpu.memory_space<vmem>>, %arg7: memref<1x32xf32, #tpu.memory_space<vmem>>, %arg8: memref<1x32xf32, #tpu.memory_space<vmem>>, %arg9: memref<1x8x32xbf16, #tpu.memory_space<vmem>>, %arg10: memref<1x8x32xbf16, #tpu.memory_space<vmem>>, %arg11: memref<1x8x32xbf16, #tpu.memory_space<vmem>>) attributes {dimension_semantics = [#tpu.dimension_semantics<parallel>, #tpu.dimension_semantics<parallel>], iteration_bounds = array<i64: 2, 1>, scalar_prefetch = 0 : i64, scratch_operands = 0 : i64, tpu.core_type = #tpu.core_type<tc>, window_params = [{transform_indices = @transform_0, window_bounds = array<i64: 1, 8, 32>}, {pipeline_mode = #tpu.pipeline_mode<synchronous>, transform_indices = @transform_1, window_bounds = array<i64: 32, 32>}, {pipeline_mode = #tpu.pipeline_mode<synchronous>, transform_indices = @transform_2, window_bounds = array<i64: 32, 32>}, {pipeline_mode = #tpu.pipeline_mode<synchronous>, transform_indices = @transform_3, window_bounds = array<i64: 32, 32>}, {pipeline_mode = #tpu.pipeline_mode<synchronous>, transform_indices = @transform_4, window_bounds = array<i64: 1, 32>}, {pipeline_mode = #tpu.pipeline_mode<synchronous>, transform_indices = @transform_5, window_bounds = array<i64: 1, 32>}, {pipeline_mode = #tpu.pipeline_mode<synchronous>, transform_indices = @transform_6, window_bounds = array<i64: 1, 32>}, {transform_indices = @transform_7, window_bounds = array<i64: 1, 8, 32>}, {transform_indices = @transform_8, window_bounds = array<i64: 1, 8, 32>}, {transform_indices = @transform_9, window_bounds = array<i64: 1, 8, 32>}]} {
    %c0 = arith.constant 0 : index
    %c0_0 = arith.constant 0 : index
    %c0_1 = arith.constant 0 : index
    %0 = vector.load %arg2[%c0, %c0_0, %c0_1] : memref<1x8x32xbf16, #tpu.memory_space<vmem>>, vector<1x8x32xbf16>
    %1 = vector.shape_cast %0 : vector<1x8x32xbf16> to vector<8x32xbf16>
    %c0_2 = arith.constant 0 : index
    %c0_3 = arith.constant 0 : index
    %2 = vector.load %arg3[%c0_2, %c0_3] : memref<32x32xbf16, #tpu.memory_space<vmem>>, vector<32x32xbf16>
    %cst = arith.constant dense<0.000000e+00> : vector<8x32xf32>
    %3 = tpu.matmul %1, %2, %cst {dimension_numbers = #tpu.dot_dimension_numbers<[1], [0], [0], [1], [0, 0, 1, 1], [], []>} : vector<8x32xbf16>, vector<32x32xbf16>, vector<8x32xf32> -> vector<8x32xf32>
    %c0_4 = arith.constant 0 : index
    %c0_5 = arith.constant 0 : index
    %4 = vector.load %arg6[%c0_4, %c0_5] : memref<1x32xf32, #tpu.memory_space<vmem>>, vector<1x32xf32>
    %5 = vector.broadcast %4 : vector<1x32xf32> to vector<8x32xf32>
    %6 = arith.addf %3, %5 : vector<8x32xf32>
    %7 = arith.truncf %6 : vector<8x32xf32> to vector<8x32xbf16>
    %c0_6 = arith.constant 0 : index
    %c0_7 = arith.constant 0 : index
    %c0_8 = arith.constant 0 : index
    %8 = vector.load %arg9[%c0_6, %c0_7, %c0_8] : memref<1x8x32xbf16, #tpu.memory_space<vmem>>, vector<1x8x32xbf16>
    %9 = vector.shape_cast %8 : vector<1x8x32xbf16> to vector<8x32xbf16>
    %10 = vector.shape_cast %7 : vector<8x32xbf16> to vector<1x8x32xbf16>
    tpu.vector_store %arg9[%c0_6, %c0_7, %c0_8], %10 {strides = array<i32>} : memref<1x8x32xbf16, #tpu.memory_space<vmem>>, vector<1x8x32xbf16>,
    %c0_9 = arith.constant 0 : index
    %c0_10 = arith.constant 0 : index
    %11 = vector.load %arg4[%c0_9, %c0_10] : memref<32x32xbf16, #tpu.memory_space<vmem>>, vector<32x32xbf16>
    %cst_11 = arith.constant dense<0.000000e+00> : vector<8x32xf32>
    %12 = tpu.matmul %1, %11, %cst_11 {dimension_numbers = #tpu.dot_dimension_numbers<[1], [0], [0], [1], [0, 0, 1, 1], [], []>} : vector<8x32xbf16>, vector<32x32xbf16>, vector<8x32xf32> -> vector<8x32xf32>
    %c0_12 = arith.constant 0 : index
    %c0_13 = arith.constant 0 : index
    %13 = vector.load %arg7[%c0_12, %c0_13] : memref<1x32xf32, #tpu.memory_space<vmem>>, vector<1x32xf32>
    %14 = vector.broadcast %13 : vector<1x32xf32> to vector<8x32xf32>
    %15 = arith.addf %12, %14 : vector<8x32xf32>
    %16 = arith.truncf %15 : vector<8x32xf32> to vector<8x32xbf16>
    %c0_14 = arith.constant 0 : index
    %c0_15 = arith.constant 0 : index
    %c0_16 = arith.constant 0 : index
    %17 = vector.load %arg10[%c0_14, %c0_15, %c0_16] : memref<1x8x32xbf16, #tpu.memory_space<vmem>>, vector<1x8x32xbf16>
    %18 = vector.shape_cast %17 : vector<1x8x32xbf16> to vector<8x32xbf16>
    %19 = vector.shape_cast %16 : vector<8x32xbf16> to vector<1x8x32xbf16>
    tpu.vector_store %arg10[%c0_14, %c0_15, %c0_16], %19 {strides = array<i32>} : memref<1x8x32xbf16, #tpu.memory_space<vmem>>, vector<1x8x32xbf16>,
    %c0_17 = arith.constant 0 : index
    %c0_18 = arith.constant 0 : index
    %20 = vector.load %arg5[%c0_17, %c0_18] : memref<32x32xbf16, #tpu.memory_space<vmem>>, vector<32x32xbf16>
    %cst_19 = arith.constant dense<0.000000e+00> : vector<8x32xf32>
    %21 = tpu.matmul %1, %20, %cst_19 {dimension_numbers = #tpu.dot_dimension_numbers<[1], [0], [0], [1], [0, 0, 1, 1], [], []>} : vector<8x32xbf16>, vector<32x32xbf16>, vector<8x32xf32> -> vector<8x32xf32>
    %c0_20 = arith.constant 0 : index
    %c0_21 = arith.constant 0 : index
    %22 = vector.load %arg8[%c0_20, %c0_21] : memref<1x32xf32, #tpu.memory_space<vmem>>, vector<1x32xf32>
    %23 = vector.broadcast %22 : vector<1x32xf32> to vector<8x32xf32>
    %24 = arith.addf %21, %23 : vector<8x32xf32>
    %25 = arith.truncf %24 : vector<8x32xf32> to vector<8x32xbf16>
    %c0_22 = arith.constant 0 : index
    %c0_23 = arith.constant 0 : index
    %c0_24 = arith.constant 0 : index
    %26 = vector.load %arg11[%c0_22, %c0_23, %c0_24] : memref<1x8x32xbf16, #tpu.memory_space<vmem>>, vector<1x8x32xbf16>
    %27 = vector.shape_cast %26 : vector<1x8x32xbf16> to vector<8x32xbf16>
    %28 = vector.shape_cast %25 : vector<8x32xbf16> to vector<1x8x32xbf16>
    tpu.vector_store %arg11[%c0_22, %c0_23, %c0_24], %28 {strides = array<i32>} : memref<1x8x32xbf16, #tpu.memory_space<vmem>>, vector<1x8x32xbf16>,
    return
  }
  func.func @transform_0(%arg0: i32, %arg1: i32) -> (i32, i32, i32) {
    %c0_i32 = arith.constant 0 : i32
    %c0_i32_0 = arith.constant 0 : i32
    return %arg0, %arg1, %c0_i32 : i32, i32, i32
  }
  func.func @transform_1(%arg0: i32, %arg1: i32) -> (i32, i32) {
    %c0_i32 = arith.constant 0 : i32
    %c0_i32_0 = arith.constant 0 : i32
    %c0_i32_1 = arith.constant 0 : i32
    return %c0_i32, %c0_i32_0 : i32, i32
  }
  func.func @transform_2(%arg0: i32, %arg1: i32) -> (i32, i32) {
    %c0_i32 = arith.constant 0 : i32
    %c0_i32_0 = arith.constant 0 : i32
    %c0_i32_1 = arith.constant 0 : i32
    return %c0_i32, %c0_i32_0 : i32, i32
  }
  func.func @transform_3(%arg0: i32, %arg1: i32) -> (i32, i32) {
    %c0_i32 = arith.constant 0 : i32
    %c0_i32_0 = arith.constant 0 : i32
    %c0_i32_1 = arith.constant 0 : i32
    return %c0_i32, %c0_i32_0 : i32, i32
  }
  func.func @transform_4(%arg0: i32, %arg1: i32) -> (i32, i32) {
    %c0_i32 = arith.constant 0 : i32
    %c0_i32_0 = arith.constant 0 : i32
    %c0_i32_1 = arith.constant 0 : i32
    return %c0_i32, %c0_i32_0 : i32, i32
  }
  func.func @transform_5(%arg0: i32, %arg1: i32) -> (i32, i32) {
    %c0_i32 = arith.constant 0 : i32
    %c0_i32_0 = arith.constant 0 : i32
    %c0_i32_1 = arith.constant 0 : i32
    return %c0_i32, %c0_i32_0 : i32, i32
  }
  func.func @transform_6(%arg0: i32, %arg1: i32) -> (i32, i32) {
    %c0_i32 = arith.constant 0 : i32
    %c0_i32_0 = arith.constant 0 : i32
    %c0_i32_1 = arith.constant 0 : i32
    return %c0_i32, %c0_i32_0 : i32, i32
  }
  func.func @transform_7(%arg0: i32, %arg1: i32) -> (i32, i32, i32) {
    %c0_i32 = arith.constant 0 : i32
    %c0_i32_0 = arith.constant 0 : i32
    return %arg0, %arg1, %c0_i32 : i32, i32, i32
  }
  func.func @transform_8(%arg0: i32, %arg1: i32) -> (i32, i32, i32) {
    %c0_i32 = arith.constant 0 : i32
    %c0_i32_0 = arith.constant 0 : i32
    return %arg0, %arg1, %c0_i32 : i32, i32, i32
  }
  func.func @transform_9(%arg0: i32, %arg1: i32) -> (i32, i32, i32) {
    %c0_i32 = arith.constant 0 : i32
    %c0_i32_0 = arith.constant 0 : i32
    return %arg0, %arg1, %c0_i32 : i32, i32, i32
  }
}

</mosaic_0001>

<bundles_post_ra>
// kernel: tpu_custom_call.1
= control target key start
LH: loop header
LB: loop body
LE: loop exit
PB: predicated region body
PF: predicated region fallthrough
CT: control target
= control target key end

     0   :  { %s1746_s0 = inlined_call_operand.hbm [shape: bf16[2,8,32], index: 0, kind: input, shape index: {}]   ;;  %s1747_s1 = inlined_call_operand.hbm [shape: bf16[32,32], index: 1, kind: input, shape index: {}]   ;;  %s1748_s2 = inlined_call_operand.hbm [shape: bf16[32,32], index: 2, kind: input, shape index: {}]   ;;  %s1749_s3 = inlined_call_operand.hbm [shape: bf16[32,32], index: 3, kind: input, shape index: {}]   ;;  %s1750_s4 = inlined_call_operand.vmem [shape: f32[1,32], index: 4, kind: input, shape index: {}]   ;;  %s1751_s5 = inlined_call_operand.vmem [shape: f32[1,32], index: 5, kind: input, shape index: {}]   ;;  %s1752_s6 = inlined_call_operand.vmem [shape: f32[1,32], index: 6, kind: input, shape index: {}]   ;;  %s1753_s7 = inlined_call_operand.hbm [shape: bf16[2,8,32], index: 7, kind: output, shape index: {0}]   ;;  %s1754_s8 = inlined_call_operand.hbm [shape: bf16[2,8,32], index: 8, kind: output, shape index: {1}]   ;;  %s1755_s9 = inlined_call_operand.hbm [shape: bf16[2,8,32], index: 9, kind: output, shape index: {2}]  }
   0x1   :  { %1765 = sst [smem:[#allocation21_spill]] %s1746_s0 }
   0x2   :  { %1766 = sst [smem:[#allocation22_spill]] %s1747_s1 }
   0x3   :  { %1767 = sst [smem:[#allocation23_spill]] %s1752_s6 }
   0x4   :  { %1768 = sst [smem:[#allocation24_spill]] %s1754_s8 }
   0x5   :  { %1769 = sst [smem:[#allocation25_spill]] %s1755_s9 }
   0x6   :  { %15 = vsyncpa [#allocation3], 0 }
   0x7   :  { %17 = vsyncpa [#allocation3 + $0x1], 0 }
   0x8   :  { %18 = vsyncpa [#allocation6], 0 }
   0x9   :  { %19 = vsyncpa [#allocation9], 0 }
   0xa   :  { %20 = vsyncpa [#allocation4], 0 }
   0xb   :  { %22 = vsyncpa [#allocation4 + $0x1], 0 }
   0xc   :  { %23 = vsyncpa [#allocation12], 0 }
   0xd   :  { %25 = vsyncpa [#allocation12 + $0x1], 0  ;;  %s1368_s30 = smov 0   ;;  %s1370_s10 = smov 0  }
   0xe   :  { %s1372_s11 = smov 0   ;;  %s1374_s12 = smov 0  }
   0xf   :  { %s1376_s13 = smov 0   ;;  %s1378_s14 = smov 0  }
  0x10 LB: > { %1770 = sst [smem:[#allocation19_spill]] %s1285_s30  ;;  %s1399_s15 = sadd.s32 4294967295, %s1305_s14   ;;  %s1305_s14 = sphi %s1378_s14, %s31_s14   ;;  %s1301_s13 = sphi %s1376_s13, %s1802_s13   ;;  %s1297_s12 = sphi %s1374_s12, %s1801_s12   ;;  %s1293_s11 = sphi %s1372_s11, %s1800_s11   ;;  %s1289_s10 = sphi %s1370_s10, %s1799_s10   ;;  %s1285_s30 = sphi %s1368_s30, %s1798_s30  }
  0x11   : > { %s1756_s16 = sadd.s32 4294967294, %s1305_s14   ;;  %p65_p0 = scmp.ne.s32.totalorder %s1289_s10, %s1285_s30 }
  0x12   : > { %p1758_p1 = scmp.eq.s32.totalorder %s1399_s15, 0  ;;  %p223_p3 = scmp.eq.s32.totalorder %s1756_s16, 1 }
  0x13   : > { %p860_p5 = scmp.ge.s32.totalorder %s1305_s14, 1  ;;  %p286_p7 = scmp.lt.s32.totalorder %s1305_s14, 3 }
  0x14   : > { %p1410_p4 = por %p1758_p1, %p65_p0  ;;  %p1415_p6 = por %p223_p3, %p65_p0 }
  0x15   : > { %p1420_p8 = pnand %p860_p5, %p286_p7  ;;  %s1307_s20 = smov [#allocation5]  }
  0x16   : > { %s1771_s17 = scalar_select %p1410_p4, 1, 0 }
  0x17   : > { %s1772_s18 = scalar_select %p1415_p6, 1, 0 }
  0x18   : > { %s1774_s19 = scalar_select %p1420_p8, 1, 0 }
  0x19   : > { %1773 = sst [smem:[#allocation20_spill]] %s1772_s18  ;;  %s298_s21 = sshll.u32 %s1307_s20, 4  ;;  %s1424_s21 = int_to_ptr.vmem [resolvable:$true] %s298_s21 }
  0x1a   : > { %p948_p9 = pneg %p1420_p8  ;;  %s1308_s23 = smov [#allocation7]  }
  0x1b   : > { %s311_s24 = sshll.u32 %s1308_s23, 4  ;;  %s1309_s25 = smov [#allocation8]   ;;  %s1435_s24 = int_to_ptr.vmem [resolvable:$true] %s311_s24 }
  0x1c   : > { %p1431_p11 = pnand %p948_p9, %p1758_p1  ;;  %s1437_s26 = sshll.u32 %s1309_s25, 4  ;;  %s325_s26 = int_to_ptr.vmem [resolvable:$true] %s1437_s26 }
  0x1d   : > { %s1776_s1 = sld [smem:[#allocation22_spill]] }
  0x1e   : > { %p1447_p13 = pneg %p1431_p11 }
  0x23   : > { %s1041_s29 = scalar_lea.hbm %s1776_s1, 256 }
  0x24   : > { %p1042_p12 = scmp.ne.s32.totalorder %s1776_s1, %s1041_s29  ;;  %p1048_p5 = scmp.lt.u32.totalorder %s1041_s29, %s1776_s1 }
  0x26   : > { %p1044_p0 = pnand %p1447_p13, %p1042_p12 }
  0x28   : > { %p1045_p3 = pneg %p1044_p0 }
  0x2a   : > { %p1050_p7 = pnand %p1048_p5, %p1045_p3 }
  0x2c   : > { %1053 = shalt.err (!%p1050_p7)
}
  0x2d   : > { %s1054_s16 = scalar_lea.vmem %s1424_s21, 256  ;;  %p1062_p2 = scmp.lt.s32.totalorder %s1424_s21, %s1424_s21 }
  0x2e   : > { %p1055_p9 = scmp.ne.s32.totalorder %s1424_s21, %s1054_s16  ;;  %p1063_p6 = scmp.lt.s32.totalorder %s1054_s16, %s1054_s16 }
  0x30   : > { %p1057_p10 = pnand %p1055_p9, %p1447_p13  ;;  %p1064_p12 = por %p1063_p6, %p1062_p2 }
  0x32   : > { %p1058_p1 = pneg %p1057_p10 }
  0x34   : > { %p1065_p0 = pnand %p1064_p12, %p1058_p1 }
  0x36   : > { %1068 = shalt.err (!%p1065_p0)
}
  0x37   : > { %s1310_s27 = smov 64   ;;  %s1311_s28 = smov 4  }
  0x38   : > { %951 = dma.hbm_to_vmem [thread:$0]  (!%p1431_p11), %s1776_s1, 256, %s1424_s21, [#allocation6], %s1310_s27, %s1310_s27, %s1311_s28  }
  0x39   : > { %s1069_s16 = scalar_lea.hbm %s1748_s2, 256 }
  0x3a   : > { %p1070_p1 = scmp.ne.s32.totalorder %s1748_s2, %s1069_s16  ;;  %p1076_p10 = scmp.lt.u32.totalorder %s1069_s16, %s1748_s2 }
  0x3c   : > { %p1072_p2 = pnand %p1070_p1, %p1447_p13 }
  0x3e   : > { %p1073_p6 = pneg %p1072_p2 }
  0x40   : > { %p1078_p3 = pnand %p1076_p10, %p1073_p6 }
  0x42   : > { %1081 = shalt.err (!%p1078_p3)
}
  0x43   : > { %s1082_s21 = scalar_lea.vmem %s1435_s24, 256  ;;  %p1090_p12 = scmp.lt.s32.totalorder %s1435_s24, %s1435_s24 }
  0x44   : > { %p1083_p5 = scmp.ne.s32.totalorder %s1435_s24, %s1082_s21  ;;  %p1091_p0 = scmp.lt.s32.totalorder %s1082_s21, %s1082_s21 }
  0x46   : > { %p1085_p7 = pnand %p1083_p5, %p1447_p13  ;;  %p1092_p1 = por %p1091_p0, %p1090_p12 }
  0x48   : > { %p1086_p9 = pneg %p1085_p7 }
  0x4a   : > { %p1093_p2 = pnand %p1092_p1, %p1086_p9 }
  0x4c   : > { %1096 = shalt.err (!%p1093_p2)
}
  0x4d   : > { %954 = dma.hbm_to_vmem [thread:$0]  (!%p1431_p11), %s1748_s2, 256, %s1435_s24, [#allocation6], %s1310_s27, %s1310_s27, %s1311_s28  }
  0x4e   : > { %s1097_s29 = scalar_lea.hbm %s1749_s3, 256 }
  0x4f   : > { %p1098_p6 = scmp.ne.s32.totalorder %s1749_s3, %s1097_s29  ;;  %p1104_p5 = scmp.lt.u32.totalorder %s1097_s29, %s1749_s3 }
  0x51   : > { %p1100_p10 = pnand %p1098_p6, %p1447_p13 }
  0x53   : > { %p1101_p3 = pneg %p1100_p10 }
  0x55   : > { %p1106_p7 = pnand %p1104_p5, %p1101_p3 }
  0x57   : > { %1109 = shalt.err (!%p1106_p7)
}
  0x58   : > { %s1110_s21 = scalar_lea.vmem %s325_s26, 256  ;;  %p1118_p1 = scmp.lt.s32.totalorder %s325_s26, %s325_s26 }
  0x59   : > { %p1111_p9 = scmp.ne.s32.totalorder %s325_s26, %s1110_s21  ;;  %p1119_p2 = scmp.lt.s32.totalorder %s1110_s21, %s1110_s21 }
  0x5b   : > { %p1113_p12 = pnand %p1111_p9, %p1447_p13  ;;  %p1120_p4 = por %p1119_p2, %p1118_p1 }
  0x5d   : > { %p1114_p0 = pneg %p1113_p12 }
  0x5f   : > { %p1121_p8 = pnand %p1120_p4, %p1114_p0 }
  0x61   : > { %1124 = shalt.err (!%p1121_p8)
}
  0x62   : > { %957 = dma.hbm_to_vmem [thread:$0]  (!%p1431_p11), %s1749_s3, 256, %s325_s26, [#allocation9], %s1310_s27, %s1310_s27, %s1311_s28  }
  0x63   : > { %s52_s18 = sadd.s32 1, %s1293_s11  ;;  %s43_s22 = sadd.s32 1, %s1301_s13 }
  0x64   : > { %p59_p4 = scmp.ne.s32.totalorder %s1293_s11, %s1289_s10  ;;  %p45_p8 = scmp.ge.s32.totalorder %s43_s22, 2 }
  0x65   : > { %p60_p13 = scmp.eq.s32.totalorder %s1305_s14, 0  ;;  %p1778_p6 = scmp.eq.s32.totalorder %s1399_s15, 1 }
  0x66   : > { %p975_p3 = scmp.lt.s32.totalorder %s1305_s14, 2  ;;  %s1804_s22 = smov (%p45_p8, %s43_s22), 0 }
  0x67   : > { %p1526_p10 = por %p1778_p6, %p59_p4  ;;  %p61_p5 = por %p60_p13, %p59_p4 }
  0x68   : > { %s347_s9 = sand.u32 1, %s1293_s11   ;;  %s47_s30 = ssub.s32 %s1301_s13, %s1804_s22 }
  0x69   : > { %p50_p7 = scmp.eq.s32.totalorder %s47_s30, 0  ;;  %s865_s26 = sshll.u32 %s347_s9, 2 }
  0x6a   : > { %s866_s27 = sshll.u32 %s1301_s13, 6  ;;  %s1780_s0 = sld [smem:[#allocation21_spill]] }
  0x6b   : > { %s1538_s28 = scalar_select %p50_p7, %s1293_s11, %s52_s18  }
  0x6c   : > { %s351_s25 = scalar_lea.vmem [#allocation2], %s865_s26  ;;  %p1549_p11 = pnand %p975_p3, %p61_p5 }
  0x6d   : > { %s359_s16 = sshll.u32 %s351_s25, 4  ;;  %s348_s24 = scalar_lea.sflag [#allocation3], %s347_s9  ;;  %s1545_s16 = int_to_ptr.vmem [resolvable:$true] %s359_s16 }
  0x6e   : > { %p1127_p12 = pneg %p1549_p11 }
  0x70   : > { %s1543_s23 = scalar_lea.hbm %s1780_s0, %s866_s27  ;;  %s1130_s26 = scalar_lea.hbm %s1780_s0, 128 }
  0x71   : > { %s1125_s6 = scalar_lea.hbm %s1543_s23, 64  ;;  %p1131_p2 = scmp.lt.u32.totalorder %s1543_s23, %s1780_s0 }
  0x72   : > { %p1126_p9 = scmp.ne.s32.totalorder %s1543_s23, %s1125_s6  ;;  %p1132_p4 = scmp.lt.u32.totalorder %s1130_s26, %s1125_s6 }
  0x73   : > { %p1134_p13 = scmp.lt.u32.totalorder %s1125_s6, %s1543_s23 }
  0x74   : > { %p1128_p0 = pnand %p1127_p12, %p1126_p9  ;;  %p1133_p8 = por %p1132_p4, %p1131_p2 }
  0x76   : > { %p1129_p1 = pneg %p1128_p0  ;;  %p1135_p6 = por %p1134_p13, %p1133_p8 }
  0x78   : > { %p1136_p3 = pnand %p1135_p6, %p1129_p1 }
  0x7a   : > { %1139 = shalt.err (!%p1136_p3)
}
  0x7b   : > { %s1140_s9 = scalar_lea.vmem %s1545_s16, 64  ;;  %s1312_s20 = smov [#allocation2]  }
  0x7c   : > { %p1141_p5 = scmp.ne.s32.totalorder %s1545_s16, %s1140_s9  ;;  %s1145_s25 = sshll.u32 %s1312_s20, 4  ;;  %s1146_s25 = int_to_ptr.vmem [resolvable:$false] %s1145_s25 }
  0x7d   : > { %s1147_s18 = scalar_lea.vmem %s1146_s25, 128  ;;  %p1148_p0 = scmp.lt.s32.totalorder %s1545_s16, %s1146_s25 }
  0x7e   : > { %p1143_p7 = pnand %p1141_p5, %p1127_p12  ;;  %p1149_p2 = scmp.lt.s32.totalorder %s1147_s18, %s1140_s9 }
  0x80   : > { %p1144_p9 = pneg %p1143_p7  ;;  %p1150_p4 = por %p1149_p2, %p1148_p0 }
  0x82   : > { %p1151_p8 = pnand %p1150_p4, %p1144_p9 }
  0x84   : > { %1154 = shalt.err (!%p1151_p8)
}
  0x85   : > { %961 = dma.hbm_to_vmem [thread:$0]  (!%p1549_p11), %s1543_s23, 64, %s1545_s16, %s348_s24  }
  0x86   : > { %p1782_p1 = scmp.ne.s32.totalorder %s1774_s19, 0 }
  0x87   : > { %s1581_s6 = sand.u32 (!%p1782_p1), 1, %s1289_s10   ;;  %p1783_p12 = scmp.ne.s32.totalorder (!%p1782_p1), %s1771_s17, 0 }
  0x88   : > { %368 = sbr.rel (%p1782_p1) target bundleno = 438 (0x1b6), region = 48  ;;  %s1584_s30 = sshll.u32 (!%p1782_p1), %s1581_s6, 2 }
  0x89   : > { %s371_s26 = scalar_lea.sflag (!%p1782_p1), [#allocation3], %s1581_s6  ;;  %s374_s27 = scalar_lea.vmem (!%p1782_p1), [#allocation2], %s1584_s30 }
  0x8f   : > { %1264 = dma.done.wait (%p1783_p12), %s371_s26, 64  }
  0x90   : > { %1266 = vsyncadd (%p1783_p12), %s371_s26, 4294967232  ;;  %p1784_p11 = scmp.eq.s32.totalorder %s1399_s15, 0 }
  0x92   : > { %1268 = dma.done.wait (%p1784_p11), [#allocation6], 512   ;;  %p1785_p13 = pmov %p1784_p11 }
  0x93   : > { %p1786_p6 = pmov %p1784_p11 }
  0x94   : > { %1270 = vsyncadd (%p1785_p13), [#allocation6], 4294966784 }
  0x95   : > { %1272 = dma.done.wait (%p1786_p6), [#allocation9], 256   ;;  %p1787_p3 = pmov %p1786_p6 }
  0x96   : > { %v1313_v0 = vmov 0.0   ;;  %vm1314_vm0 = vmmov 0   ;;  %v1035_v1 = vld [vmem:[#allocation5] sm:$0xff]   ;;  %v1036_v2 = vld [vmem:[#allocation5 + $0x8] sm:$0xff]   ;;  %v1037_v3 = vld [vmem:[#allocation7] sm:$0xff]   ;;  %vm456_vm1 = vcmask 261120  }
  0x97   : > { %1274 = vsyncadd (%p1787_p3), [#allocation9], 4294967040  ;;  %904 = vmatprep.subr.bf16.mxu0 %v1313_v0  ;;  %912 = vmatprep.subr.bf16.mxu1 %v1313_v0  ;;  %v1039_v4 = vld [vmem:[#allocation7 + $0x8] sm:$0xff]   ;;  %v1038_v6 = vld [vmem:[#allocation8] sm:$0xff]   ;;  %s1610_s21 = sshll.u32 %s1297_s12, 6  ;;  %s416_s24 = scalar_lea.vmem [#allocation10], %s1584_s30 }
  0x98   : > { %908 = vmatprep.mubr.msk.bf16.mxu0 %vm1314_vm0, %v1313_v0  ;;  %916 = vmatprep.mubr.msk.bf16.mxu1 %vm1314_vm0, %v1313_v0  ;;  %v432_v5 = vld [vmem:[%s374_s27] sm:$0xf]  ;;  %v1040_v7 = vld [vmem:[#allocation8 + $0x8] sm:$0xff]   ;;  %s658_s29 = sshll.u32 %s416_s24, 4  ;;  %vm501_vm2 = vcmask 257024   ;;  %s1764_s20 = scalar_lea.vmem [#allocation11], %s1584_s30  ;;  %s1623_s29 = int_to_ptr.vmem [resolvable:$true] %s658_s29 }
  0x99   : > { %905 = vmatpush3.bf16.msra.mxu0 %v1035_v1  ;;  %913 = vmatpush3.bf16.msra.mxu1 %v1037_v3  ;;  %v875_v8 = vld [vmem:[%s1750_s4] ss:$0 sm:$0xff]  ;;  %s672_s25 = sshll.u32 %s1764_s20, 4  ;;  %s1621_s26 = scalar_lea.hbm %s1753_s7, %s1610_s21  ;;  %s1631_s25 = int_to_ptr.vmem [resolvable:$true] %s672_s25 }
  0x9a   : > { %906 = vmatprep.subr.bf16.mxu0 %v1313_v0  ;;  %914 = vmatprep.subr.bf16.mxu1 %v1313_v0  ;;  %v879_v10 = vld [vmem:[%s1751_s5] ss:$0 sm:$0xff]  ;;  %s1788_s19 = sld [smem:[#allocation24_spill]]  ;;  %s1789_s18 = sld [smem:[#allocation23_spill]] }
  0x9b   : > { %s634_s9 = scalar_lea.sflag [#allocation4], %s1581_s6  ;;  %s1155_s20 = scalar_lea.vmem %s1623_s29, 64 }
  0x9c   : > { %p1156_p5 = scmp.ne.s32.totalorder %s1623_s29, %s1155_s20  ;;  %s1315_s0 = smov [#allocation10]  }
  0x9d   : > { %907 = vmatpush3.bf16.msra.mxu0 %v1036_v2  ;;  %915 = vmatpush3.bf16.msra.mxu1 %v1039_v4  ;;  %s1159_s1 = sshll.u32 %s1315_s0, 4  ;;  %s1160_s1 = int_to_ptr.vmem [resolvable:$false] %s1159_s1 }
  0x9e   : > { %920 = vmatprep.subr.bf16.mxu0 %v1313_v0  ;;  %p1157_p7 = pnand %p1156_p5, %p1526_p10  ;;  %s1161_s27 = scalar_lea.vmem %s1160_s1, 128 }
  0x9f   : > { %p1162_p0 = scmp.lt.s32.totalorder %s1623_s29, %s1160_s1  ;;  %p1163_p2 = scmp.lt.s32.totalorder %s1161_s27, %s1155_s20 }
  0xa0   : > { %909 = vmatmul.mubr.msk.bf16.vlgmr.msra.gmra.mrb[0].mxu0 %vm456_vm1, %v432_v5  ;;  %917 = vmatmul.mubr.msk.bf16.vlgmr.msra.gmra.mrb[0].mxu1 %vm456_vm1, %v432_v5  ;;  %s1629_s23 = scalar_lea.hbm %s1788_s19, %s1610_s21  ;;  %v883_v22 = vld [vmem:[%s1789_s18] ss:$0 sm:$0xff]  ;;  %p1158_p9 = pneg %p1157_p7 }
  0xa1   : > { %921 = vmatpush3.bf16.msra.mxu0 %v1038_v6  ;;  %924 = vmatprep.mubr.msk.bf16.mxu0 %vm1314_vm0, %v1313_v0  ;;  %p1164_p4 = por %p1163_p2, %p1162_p0 }
  0xa2   : > { %922 = vmatprep.subr.bf16.mxu0 %v1313_v0 }
  0xa3   : > { %p1165_p8 = pnand %p1164_p4, %p1158_p9 }
  0xa5   : > { %923 = vmatpush3.bf16.msra.mxu0 %v1040_v7 }
  0xa8   : > { %925 = vmatmul.mubr.msk.bf16.vlgmr.msra.gmra.mrb[4].mxu0 %vm456_vm1, %v432_v5 }
 0x173   : > { %v494_v9 = vpop.f32.mrb[0].mxu0  ;;  %v560_v14 = vpop.f32.mrb[0].mxu1 }
 0x174   : > { %v495_v11 = vadd.f32 %v875_v8, %v494_v9  ;;  %v910_v12 = vpop.f32.mrb[1].mxu0  ;;  %v561_v17 = vadd.f32 %v879_v10, %v560_v14  ;;  %v918_v18 = vpop.f32.mrb[1].mxu1 }
 0x175   : > { %v497_v13 = vpop.f32.mrb[2].mxu0  ;;  %v563_v19 = vpop.f32.mrb[2].mxu1 }
 0x176   : > { %v500_v15 = vpack.c.bf16 %v495_v11, %v495_v11  ;;  %v911_v16 = vpop.f32.mrb[3].mxu0  ;;  %v566_v20 = vpack.c.bf16 %v561_v17, %v561_v17  ;;  %v919_v21 = vpop.f32.mrb[3].mxu1 }
 0x178   : > { %502 = vst.msk [vmem:[%s416_s24] sm:$0xf] %vm501_vm2, %v500_v15 }
 0x179   : > { %1168 = shalt.err (!%p1165_p8)
}
 0x17a   : > { %s1169_s6 = scalar_lea.hbm %s1621_s26, 64  ;;  %s1173_s0 = scalar_lea.hbm %s1753_s7, 128 }
 0x17b   : > { %p1170_p1 = scmp.ne.s32.totalorder %s1621_s26, %s1169_s6  ;;  %p1174_p13 = scmp.lt.u32.totalorder %s1621_s26, %s1753_s7 }
 0x17c   : > { %p1175_p6 = scmp.lt.u32.totalorder %s1173_s0, %s1169_s6  ;;  %p1177_p5 = scmp.lt.u32.totalorder %s1169_s6, %s1621_s26 }
 0x17d   : > { %p1171_p12 = pnand %p1170_p1, %p1526_p10 }
 0x17e   : > { %p1176_p3 = por %p1175_p6, %p1174_p13 }
 0x17f   : > { %p1172_p11 = pneg %p1171_p12 }
 0x180   : > { %p1178_p7 = por %p1177_p5, %p1176_p3 }
 0x182   : > { %p1179_p9 = pnand %p1178_p7, %p1172_p11 }
 0x184   : > { %1182 = shalt.err (!%p1179_p9)
}
 0x185   : > { %942 = dma.vmem_to_hbm [thread:$0]  (%p1526_p10), %s1623_s29, 64, %s1621_s26, %s634_s9   ;;  %v625_v23 = vpop.f32.mrb[4].mxu0 }
 0x186   : > { %s1790_s20 = scalar_lea.vmem [#allocation11], %s1584_s30  ;;  %s430_s12 = scalar_lea.vmem [#allocation13], %s1584_s30 }
 0x187   : > { %567 = vst.msk [vmem:[%s1790_s20] sm:$0xf] %vm501_vm2, %v566_v20  ;;  %s1665_s18 = sshll.u32 %s430_s12, 4  ;;  %s1791_s27 = sand.u32 1, %s1399_s15   ;;  %s687_s18 = int_to_ptr.vmem [resolvable:$true] %s1665_s18 }
 0x188   : > { %s1669_s6 = scalar_lea.sflag [#allocation12], %s1791_s27  ;;  %s1183_s24 = scalar_lea.vmem %s1631_s25, 64 }
 0x189   : > { %p1184_p0 = scmp.ne.s32.totalorder %s1631_s25, %s1183_s24  ;;  %s1316_s17 = smov [#allocation11]  }
 0x18a   : > { %s1187_s0 = sshll.u32 %s1316_s17, 4  ;;  %s1188_s0 = int_to_ptr.vmem [resolvable:$false] %s1187_s0 }
 0x18b   : > { %p1185_p2 = pnand %p1184_p0, %p1526_p10  ;;  %s1189_s29 = scalar_lea.vmem %s1188_s0, 128 }
 0x18c   : > { %p1190_p8 = scmp.lt.s32.totalorder %s1631_s25, %s1188_s0  ;;  %p1191_p1 = scmp.lt.s32.totalorder %s1189_s29, %s1183_s24 }
 0x18d   : > { %p1186_p4 = pneg %p1185_p2 }
 0x18e   : > { %p1192_p12 = por %p1191_p1, %p1190_p8 }
 0x190   : > { %p1193_p11 = pnand %p1192_p12, %p1186_p4 }
 0x192   : > { %1196 = shalt.err (!%p1193_p11)
}
 0x193   : > { %s1197_s15 = scalar_lea.hbm %s1629_s23, 64  ;;  %s1201_s16 = scalar_lea.hbm %s1788_s19, 128 }
 0x194   : > { %p1198_p13 = scmp.ne.s32.totalorder %s1629_s23, %s1197_s15  ;;  %p1202_p5 = scmp.lt.u32.totalorder %s1629_s23, %s1788_s19 }
 0x195   : > { %p1203_p7 = scmp.lt.u32.totalorder %s1201_s16, %s1197_s15  ;;  %p1205_p0 = scmp.lt.u32.totalorder %s1197_s15, %s1629_s23 }
 0x196   : > { %p1199_p6 = pnand %p1198_p13, %p1526_p10 }
 0x197   : > { %p1204_p9 = por %p1203_p7, %p1202_p5 }
 0x198   : > { %p1200_p3 = pneg %p1199_p6 }
 0x199   : > { %p1206_p2 = por %p1205_p0, %p1204_p9 }
 0x19b   : > { %p1207_p4 = pnand %p1206_p2, %p1200_p3 }
 0x19d   : > { %1210 = shalt.err (!%p1207_p4)
}
 0x19e   : > { %943 = dma.vmem_to_hbm [thread:$0]  (%p1526_p10), %s1631_s25, 64, %s1629_s23, %s1669_s6   ;;  %v626_v24 = vadd.f32 %v883_v22, %v625_v23  ;;  %v926_v25 = vpop.f32.mrb[5].mxu0 }
 0x19f   : > { %v628_v26 = vpop.f32.mrb[6].mxu0  ;;  %s1792_s17 = sld [smem:[#allocation25_spill]]  ;;  %s1211_s29 = scalar_lea.vmem %s687_s18, 64 }
 0x1a0   : > { %v631_v27 = vpack.c.bf16 %v626_v24, %v626_v24  ;;  %v927_v28 = vpop.f32.mrb[7].mxu0  ;;  %p1212_p8 = scmp.ne.s32.totalorder %s687_s18, %s1211_s29  ;;  %s1317_s25 = smov [#allocation13]  }
 0x1a1   : > { %s1215_s23 = sshll.u32 %s1317_s25, 4  ;;  %s1216_s23 = int_to_ptr.vmem [resolvable:$false] %s1215_s23 }
 0x1a2   : > { %632 = vst.msk [vmem:[%s430_s12] sm:$0xf] %vm501_vm2, %v631_v27  ;;  %p1213_p1 = pnand %p1212_p8, %p1526_p10  ;;  %s1217_s15 = scalar_lea.vmem %s1216_s23, 128 }
 0x1a3   : > { %p1218_p11 = scmp.lt.s32.totalorder %s687_s18, %s1216_s23  ;;  %p1219_p13 = scmp.lt.s32.totalorder %s1217_s15, %s1211_s29 }
 0x1a4   : > { %p1214_p12 = pneg %p1213_p1 }
 0x1a5   : > { %s1697_s0 = scalar_lea.hbm %s1792_s17, %s1610_s21  ;;  %p1220_p6 = por %p1219_p13, %p1218_p11 }
 0x1a7   : > { %p1221_p3 = pnand %p1220_p6, %p1214_p12 }
 0x1a9   : > { %1224 = shalt.err (!%p1221_p3)
}
 0x1aa   : > { %s1225_s30 = scalar_lea.hbm %s1697_s0, 64  ;;  %s1229_s9 = scalar_lea.hbm %s1792_s17, 128 }
 0x1ab   : > { %p1226_p5 = scmp.ne.s32.totalorder %s1697_s0, %s1225_s30  ;;  %p1230_p0 = scmp.lt.u32.totalorder %s1697_s0, %s1792_s17 }
 0x1ac   : > { %p1231_p2 = scmp.lt.u32.totalorder %s1229_s9, %s1225_s30  ;;  %p1233_p8 = scmp.lt.u32.totalorder %s1225_s30, %s1697_s0 }
 0x1ad   : > { %p1227_p7 = pnand %p1226_p5, %p1526_p10 }
 0x1ae   : > { %p1232_p4 = por %p1231_p2, %p1230_p0 }
 0x1af   : > { %p1228_p9 = pneg %p1227_p7 }
 0x1b0   : > { %p1234_p1 = por %p1233_p8, %p1232_p4 }
 0x1b2   : > { %p1235_p12 = pnand %p1234_p1, %p1228_p9 }
 0x1b4   : > { %1238 = shalt.err (!%p1235_p12)
}
 0x1b5   : > { %944 = dma.vmem_to_hbm [thread:$0]  (%p1526_p10), %s687_s18, 64, %s1697_s0, %s1669_s6  }
 0x1b6 PF: > { %s1793_s1 = sld [smem:[#allocation19_spill]]  ;;  %s1794_s20 = sld [smem:[#allocation20_spill]] }
 0x1b7   : > { %p1796_p13 = scmp.ge.s32.totalorder %s1305_s14, 2 }
 0x1bc   : > { %s698_s27 = sand.u32 1, %s1793_s1   ;;  %p1795_p11 = scmp.ne.s32.totalorder %s1794_s20, 0 }
 0x1bd   : > { %s699_s24 = scalar_lea.sflag [#allocation4], %s698_s27 }
 0x1be   : > { %p963_p6 = pnand %p1796_p13, %p1795_p11 }
 0x1c0   : > { %1276 = dma.done.wait (!%p963_p6), %s699_s24, 64  }
 0x1c1   : > { %1278 = vsyncadd (!%p963_p6), %s699_s24, 4294967232  ;;  %s1797_s29 = sadd.s32 4294967294, %s1305_s14  }
 0x1c2   : > { %s707_s25 = sand.u32 1, %s1797_s29  }
 0x1c3   : > { %s708_s23 = scalar_lea.sflag [#allocation12], %s707_s25 }
 0x1c4   : > { %1280 = dma.done.wait (!%p963_p6), %s708_s23, 128  }
 0x1c5   : > { %1282 = vsyncadd (!%p963_p6), %s708_s23, 4294967168  ;;  %s31_s14 = sadd.s32 1, %s1305_s14   ;;  %s1798_s30 = smov %s1289_s10 }
 0x1c6   : > { %p28_p10 = scmp.ge.s32.totalorder %s31_s14, 4   ;;  %s1799_s10 = smov %s1293_s11 }
 0x1c7   : > { %s1800_s11 = smov %s1538_s28  ;;  %s1801_s12 = smov %s1301_s13 }
 0x1c8   : > { %s1802_s13 = smov %s1804_s22  ;;  %30 = sbr.rel (!%p28_p10) target bundleno = 16 (0x10), region = 137 }
 0x1cf   :  { %722 = vsyncpa [#allocation3], 1 }
 0x1d0   :  { %724 = vsyncpa [#allocation3 + $0x1], 1 }
 0x1d1   :  { %725 = vsyncpa [#allocation6], 1 }
 0x1d2   :  { %726 = vsyncpa [#allocation9], 1 }
 0x1d3   :  { %727 = vsyncpa [#allocation4], 1 }
 0x1d4   :  { %729 = vsyncpa [#allocation4 + $0x1], 1 }
 0x1d5   :  { %730 = vsyncpa [#allocation12], 1 }
 0x1d6   :  { %732 = vsyncpa [#allocation12 + $0x1], 1 }

</bundles_post_ra>
